<compile_context>
chip_gen: v5e
topology: v5e:2x2
jax: 0.10.0
libtpu: 0.0.40
codegen_flags: <defaults>
</compile_context>

<pallas_src>
import jax
import jax.numpy as jnp
from jax.experimental import pallas as pl
from jax.experimental.pallas import tpu as pltpu


_PAD = -1.0e30  # exp(_PAD - anything_real) == 0 in f32; representable in bf16.


def _info_nce_tile_kernel(x_ref, row_lse_ref, col_lse_ref):
    """Per-tile partial logsumexp along both axes, one big exp per element."""
    x = x_ref[...].astype(jnp.float32)                      # (tm, tn)

    rmax = jnp.max(x, axis=1, keepdims=True)                # (tm, 1) per-row max
    t = jnp.max(rmax)                                       # scalar tile max
    p = jnp.exp(x - rmax)                                   # single full-tile exp

    # Row direction: partial LSE referenced to the per-row tile max.
    row_sum = jnp.sum(p, axis=1, keepdims=True)             # (tm, 1), >= 1
    row_lse_ref[...] = (rmax + jnp.log(row_sum)).reshape(row_lse_ref.shape)

    # Column direction reuses p:  p * exp(rmax - t) == exp(x - t)  (scale <= 1,
    # no overflow), referenced to the scalar tile max t.
    # TODO(synk): on v7x the scale+axis=0 reduction could be offloaded to the
    # idle MXU via jnp.dot(exp(rmax - t).T, p, preferred_element_type=f32).
    s = jnp.exp(rmax - t)                                    # (tm, 1), cheap
    col_sum = jnp.sum(p * s, axis=0, keepdims=True)          # (1, tn)
    col_lse_ref[...] = (t + jnp.log(col_sum)).reshape(col_lse_ref.shape)


def _pick_tile(n_pad, cap):
    """Largest multiple of 128 that divides n_pad and is <= cap."""
    best = 128
    for cand in range(128, min(cap, n_pad) + 1, 128):
        if n_pad % cand == 0:
            best = cand
    return best


def info_nce_loss(x, *, tile_m=None, tile_n=None):
    """JAX/Pallas equivalent of InfoNceLoss.forward(x) for an (n, n) matrix."""
    n = x.shape[0]
    assert x.ndim == 2 and x.shape == (n, n), "InfoNCE expects a square similarity matrix"

    # Pad to a multiple of 128 so the streaming (8,128)-tiled path works for any n.
    n_pad = ((n + 127) // 128) * 128
    if tile_n is None:
        tile_n = _pick_tile(n_pad, 2048)   # lane dim: long contiguous DMA rows
    if tile_m is None:
        tile_m = _pick_tile(n_pad, 256)    # sublane dim
    assert n_pad % tile_m == 0 and n_pad % tile_n == 0
    nb_i = n_pad // tile_m
    nb_j = n_pad // tile_n

    x_in = x
    if n_pad != n:
        pad = n_pad - n
        x_in = jnp.pad(x, ((0, pad), (0, pad)),
                       constant_values=jnp.asarray(_PAD, dtype=x.dtype))

    cost = pl.CostEstimate(
        flops=int(5 * n_pad * n_pad),
        transcendentals=int(n_pad * n_pad),   # one exp per element after sharing
        bytes_accessed=int(n_pad * n_pad * jnp.dtype(x.dtype).itemsize
                           + 4 * n_pad * (nb_i + nb_j)),
    )

    row_parts, col_parts = pl.pallas_call(
        _info_nce_tile_kernel,
        out_shape=(
            # Per-(column-block, row) partial row-LSE, sublane-oriented (no
            # in-kernel relayout needed).
            jax.ShapeDtypeStruct((nb_j, n_pad, 1), jnp.float32),
            # Per-(row-block, column) partial col-LSE, lane-dense.
            jax.ShapeDtypeStruct((nb_i, 1, n_pad), jnp.float32),
        ),
        grid=(nb_i, nb_j),
        in_specs=[pl.BlockSpec((tile_m, tile_n), lambda i, j: (i, j))],
        out_specs=(
            pl.BlockSpec((1, tile_m, 1), lambda i, j: (j, i, 0)),
            pl.BlockSpec((1, 1, tile_n), lambda i, j: (i, 0, j)),
        ),
        compiler_params=pltpu.CompilerParams(
            # Every grid step writes distinct output blocks and carries no
            # state -> both axes parallel (v7x megacore shards the grid).
            dimension_semantics=("parallel", "parallel"),
            vmem_limit_bytes=32 * 1024 * 1024,
        ),
        cost_estimate=cost,
    )(x_in)

    # O(n * n_blocks) merge + diagonal correction + normalization in the wrapper.
    row_lse = jax.nn.logsumexp(row_parts[:, :n, 0], axis=0)   # (n,)
    col_lse = jax.nn.logsumexp(col_parts[:, 0, :n], axis=0)   # (n,)
    diag = jnp.diagonal(x).astype(jnp.float32)
    return jnp.mean(row_lse - diag) + jnp.mean(col_lse - diag)


def _reference_infonce(x):
    """Pure-JAX reference mirroring the torch module."""
    xf = x.astype(jnp.float32)
    diag = jnp.diagonal(xf)
    loss_row = jnp.mean(jax.nn.logsumexp(xf, axis=1) - diag)   # CE(x, arange)
    loss_col = jnp.mean(jax.nn.logsumexp(xf, axis=0) - diag)   # CE(x.T, arange)
    return loss_row + loss_col


if __name__ == "__main__":
    key = jax.random.PRNGKey(0)
    k1, k2, k3 = jax.random.split(key, 3)

    # (1) auto tiles: n = 384 -> tiles (128, 384), grid (3, 1).
    n1 = 384
    x1 = jax.random.normal(k1, (n1, n1), dtype=jnp.float32)
    out1 = jax.block_until_ready(info_nce_loss(x1))
    ref1 = _reference_infonce(x1)
    assert jnp.allclose(out1, ref1, rtol=2e-5, atol=1e-4), (out1, ref1)

    # (2) bf16 streaming with a forced 3x3 grid of 128x128 tiles (exercises the
    #     multi-block merge along both axes).
    x2 = x1.astype(jnp.bfloat16)
    out2 = jax.block_until_ready(info_nce_loss(x2, tile_m=128, tile_n=128))
    ref2 = _reference_infonce(x2)
    assert jnp.allclose(out2, ref2, rtol=2e-5, atol=1e-4), (out2, ref2)

    # (3) n not a multiple of 128 -> wrapper-side padding path (pads to 256).
    n3 = 200
    x3 = jax.random.normal(k3, (n3, n3), dtype=jnp.float32)
    out3 = jax.block_until_ready(info_nce_loss(x3))
    ref3 = _reference_infonce(x3)
    assert jnp.allclose(out3, ref3, rtol=2e-5, atol=1e-4), (out3, ref3)

    print("KERNEL_OK")
</pallas_src>

<mosaic_0001>
module attributes {stable_mosaic.version = 11 : i64} {
  func.func @_info_nce_tile_kernel(%arg0: i32, %arg1: i32, %arg2: memref<128x384xf32, #tpu.memory_space<vmem>>, %arg3: memref<1x128x1xf32, #tpu.memory_space<vmem>>, %arg4: memref<1x1x384xf32, #tpu.memory_space<vmem>>) attributes {dimension_semantics = [#tpu.dimension_semantics<parallel>, #tpu.dimension_semantics<parallel>], iteration_bounds = array<i64: 3, 1>, scalar_prefetch = 0 : i64, scratch_operands = 0 : i64, tpu.core_type = #tpu.core_type<tc>, window_params = [{transform_indices = @transform_0, window_bounds = array<i64: 128, 384>}, {transform_indices = @transform_1, window_bounds = array<i64: 1, 128, 1>}, {transform_indices = @transform_2, window_bounds = array<i64: 1, 1, 384>}]} {
    %c0 = arith.constant 0 : index
    %c0_0 = arith.constant 0 : index
    %0 = vector.load %arg2[%c0, %c0_0] : memref<128x384xf32, #tpu.memory_space<vmem>>, vector<128x384xf32>
    %cst = arith.constant dense<0xFF800000> : vector<128xf32>
    %1 = vector.multi_reduction <maximumf>, %0, %cst [1] : vector<128x384xf32> to vector<128xf32>
    %2 = vector.shape_cast %1 : vector<128xf32> to vector<128x1xf32>
    %3 = vector.shape_cast %2 : vector<128x1xf32> to vector<1x128x1xf32>
    %cst_1 = arith.constant dense<0xFF800000> : vector<1xf32>
    %4 = vector.multi_reduction <maximumf>, %3, %cst_1 [1, 2] : vector<1x128x1xf32> to vector<1xf32>
    %5 = vector.shape_cast %4 : vector<1xf32> to vector<1x1x1xf32>
    %6 = vector.extract %5[0, 0, 0] : f32 from vector<1x1x1xf32>
    %7 = vector.broadcast %2 : vector<128x1xf32> to vector<128x384xf32>
    %8 = arith.subf %0, %7 : vector<128x384xf32>
    %9 = math.exp %8 : vector<128x384xf32>
    %cst_2 = arith.constant dense<0.000000e+00> : vector<128xf32>
    %10 = vector.multi_reduction <add>, %9, %cst_2 [1] : vector<128x384xf32> to vector<128xf32>
    %11 = vector.shape_cast %10 : vector<128xf32> to vector<128x1xf32>
    %12 = math.log %11 : vector<128x1xf32>
    %13 = arith.addf %2, %12 : vector<128x1xf32>
    %14 = vector.shape_cast %13 : vector<128x1xf32> to vector<1x128x1xf32>
    %c0_3 = arith.constant 0 : index
    %c0_4 = arith.constant 0 : index
    %c0_5 = arith.constant 0 : index
    %15 = vector.load %arg3[%c0_3, %c0_4, %c0_5] : memref<1x128x1xf32, #tpu.memory_space<vmem>>, vector<1x128x1xf32>
    tpu.vector_store %arg3[%c0_3, %c0_4, %c0_5], %14 {strides = array<i32>} : memref<1x128x1xf32, #tpu.memory_space<vmem>>, vector<1x128x1xf32>,
    %16 = vector.broadcast %6 : f32 to vector<128x1xf32>
    %17 = arith.subf %2, %16 : vector<128x1xf32>
    %18 = math.exp %17 : vector<128x1xf32>
    %19 = vector.broadcast %18 : vector<128x1xf32> to vector<128x384xf32>
    %20 = arith.mulf %9, %19 : vector<128x384xf32>
    %cst_6 = arith.constant dense<0.000000e+00> : vector<384xf32>
    %21 = vector.multi_reduction <add>, %20, %cst_6 [0] : vector<128x384xf32> to vector<384xf32>
    %22 = vector.shape_cast %21 : vector<384xf32> to vector<1x384xf32>
    %23 = math.log %22 : vector<1x384xf32>
    %24 = vector.broadcast %6 : f32 to vector<1x384xf32>
    %25 = arith.addf %24, %23 : vector<1x384xf32>
    %26 = vector.shape_cast %25 : vector<1x384xf32> to vector<1x1x384xf32>
    %c0_7 = arith.constant 0 : index
    %c0_8 = arith.constant 0 : index
    %c0_9 = arith.constant 0 : index
    %27 = vector.load %arg4[%c0_7, %c0_8, %c0_9] : memref<1x1x384xf32, #tpu.memory_space<vmem>>, vector<1x1x384xf32>
    tpu.vector_store %arg4[%c0_7, %c0_8, %c0_9], %26 {strides = array<i32>} : memref<1x1x384xf32, #tpu.memory_space<vmem>>, vector<1x1x384xf32>,
    return
  }
  func.func @transform_0(%arg0: i32, %arg1: i32) -> (i32, i32) {
    %c0_i32 = arith.constant 0 : i32
    return %arg0, %arg1 : i32, i32
  }
  func.func @transform_1(%arg0: i32, %arg1: i32) -> (i32, i32, i32) {
    %c0_i32 = arith.constant 0 : i32
    %c0_i32_0 = arith.constant 0 : i32
    return %arg1, %arg0, %c0_i32 : i32, i32, i32
  }
  func.func @transform_2(%arg0: i32, %arg1: i32) -> (i32, i32, i32) {
    %c0_i32 = arith.constant 0 : i32
    %c0_i32_0 = arith.constant 0 : i32
    return %arg0, %c0_i32, %arg1 : i32, i32, i32
  }
}

</mosaic_0001>

<bundles_post_ra>
// kernel: tpu_custom_call.1
= control target key start
LH: loop header
LB: loop body
LE: loop exit
PB: predicated region body
PF: predicated region fallthrough
CT: control target
= control target key end

     0   :  { %8 = vsyncpa [#allocation3], 0  ;;  %s2114_s0 = inlined_call_operand.hbm [shape: f32[384,384], index: 0, kind: input, shape index: {}]   ;;  %s2115_s1 = inlined_call_operand.vmem [shape: f32[1,384,1], index: 1, kind: output, shape index: {0}]   ;;  %s2116_s2 = inlined_call_operand.hbm [shape: f32[3,1,384], index: 2, kind: output, shape index: {1}]  }
   0x1   :  { %10 = vsyncpa [#allocation3 + $0x1], 0 }
   0x2   :  { %11 = vsyncpa [#allocation4], 0 }
   0x3   :  { %13 = vsyncpa [#allocation4 + $0x1], 0  ;;  %s1332_s9 = smov 0   ;;  %s1334_s10 = smov 0  }
   0x4   :  { %s1336_s11 = smov 0   ;;  %s1338_s12 = smov 0  }
   0x5   :  { %s1340_s13 = smov 0   ;;  %s1342_s14 = smov 0  }
   0x6 LB: > { %s952_s15 = sadd.s32 4294967295, %s1313_s14   ;;  %s953_s16 = sadd.s32 4294967294, %s1313_s14   ;;  %s1313_s14 = sphi %s1342_s14, %s19_s14   ;;  %s1309_s13 = sphi %s1340_s13, %s2206_s13   ;;  %s1305_s12 = sphi %s1338_s12, %s2205_s12   ;;  %s1301_s11 = sphi %s1336_s11, %s2204_s11   ;;  %s1297_s10 = sphi %s1334_s10, %s2203_s10   ;;  %s1293_s9 = sphi %s1332_s9, %s2202_s9  }
   0x7   : > { %s31_s17 = sadd.s32 1, %s1309_s13  ;;  %s40_s18 = sadd.s32 1, %s1301_s11 }
   0x8   : > { %p33_p0 = scmp.ge.s32.totalorder %s31_s17, 3  ;;  %p47_p1 = scmp.ne.s32.totalorder %s1301_s11, %s1297_s10 }
   0x9   : > { %p48_p2 = scmp.eq.s32.totalorder %s1313_s14, 0  ;;  %p53_p3 = scmp.ne.s32.totalorder %s1297_s10, %s1293_s9 }
   0xa   : > { %s2208_s17 = smov (%p33_p0, %s31_s17), 0  ;;  %p54_p5 = scmp.eq.s32.totalorder %s952_s15, 0 }
   0xb   : > { %p1373_p4 = por %p48_p2, %p47_p1  ;;  %s35_s20 = ssub.s32 %s1309_s13, %s2208_s17 }
   0xc   : > { %p107_p6 = scmp.eq.s32.totalorder %s952_s15, 2  ;;  %p38_p7 = scmp.eq.s32.totalorder %s35_s20, 0 }
   0xd   : > { %p1379_p8 = por %p54_p5, %p53_p3  ;;  %p113_p10 = scmp.eq.s32.totalorder %s953_s16, 2 }
   0xe   : > { %p1383_p9 = por %p107_p6, %p47_p1  ;;  %p983_p12 = scmp.lt.s32.totalorder %s1313_s14, 3 }
   0xf   : > { %s1388_s23 = scalar_select %p38_p7, %s1301_s11, %s40_s18  }
  0x10   : > { %p1390_p11 = por %p113_p10, %p53_p3  ;;  %s133_s25 = sand.u32 1, %s1301_s11  }
  0x11   : > { %s964_s26 = smul.u32 384, %s133_s25  ;;  %p976_p13 = pnand %p983_p12, %p1373_p4 }
  0x12   : > { %s965_s27 = smul.u32 384, %s1309_s13  ;;  %p959_p0 = scmp.ge.s32.totalorder %s1313_s14, 1 }
  0x13   : > { %s137_s3 = scalar_lea.vmem [#allocation2], %s964_s26  ;;  %s134_s6 = scalar_lea.sflag [#allocation3], %s133_s25 }
  0x14   : > { %s145_s30 = scalar_lea.hbm %s2114_s0, %s965_s27  ;;  %s148_s4 = sshll.u32 %s137_s3, 4  ;;  %s149_s4 = int_to_ptr.vmem [resolvable:$true] %s148_s4 }
  0x15   : > { %s146_s5 = sshll.u32 %s145_s30, 4  ;;  %s1315_s7 = smov 384   ;;  %s147_s5 = int_to_ptr.hbm [resolvable:$true] %s146_s5 }
  0x16   : > { %s1316_s8 = smov 24   ;;  %p156_p1 = scmp.lt.s32.totalorder %s1313_s14, 4 }
  0x17   : > { %978 = dma.hbm_to_vmem [thread:$0]  (!%p976_p13), %s147_s5, 6144, %s149_s4, %s134_s6, %s1315_s7, %s1315_s7, %s1316_s8  }
  0x18   : > { %p157_p2 = pnand %p959_p0, %p156_p1 }
  0x1a   : > { %160 = sbr.rel (%p157_p2) target bundleno = 359 (0x167), region = 24 }
  0x1f   : > { %s1405_s15 = sand.u32 1, %s1297_s10  }
  0x20   : > { %s966_s16 = smul.u32 384, %s1405_s15  ;;  %s163_s18 = scalar_lea.sflag [#allocation3], %s1405_s15 }
  0x22   : > { %s1409_s19 = scalar_lea.vmem [#allocation2], %s966_s16 }
  0x23   : > { %1284 = dma.done.wait (%p1379_p8), %s163_s18, 6144  }
  0x24   : > { %1286 = vsyncadd (%p1379_p8), %s163_s18, 4294961152  ;;  %v1416_v0 = vld [vmem:[%s1409_s19 + $0x60] sm:$0xff]  ;;  %v1419_v1 = vld [vmem:[%s1409_s19 + $0x68] sm:$0xff]  ;;  %s960_s21 = sshll.u32 %s1305_s12, 4  ;;  %vm600_vm0 = vcmask 7168   ;;  %s967_s30 = smul.u32 3, %s1405_s15 }
  0x25   : > { %v1422_v2 = vld [vmem:[%s1409_s19 + $0x70] sm:$0xff]  ;;  %v274_v3 = vmax.f32 %v1416_v0, %v1419_v1  ;;  %v1430_v5 = vld [vmem:[%s1409_s19 + $0x38] sm:$0xff]  ;;  %v1433_v6 = vld [vmem:[%s1409_s19 + $0x40] sm:$0xff]  ;;  %p1928_p3 = scmp.lt.s32.totalorder %s960_s21, 47  ;;  %s970_s3 = smul.u32 3, %s1305_s12  ;;  %vm791_vm1 = vcmask 1040384  }
  0x26   : > { %v1427_v4 = vld [vmem:[%s1409_s19 + $0x30] sm:$0xff]  ;;  %v1438_v8 = vld [vmem:[%s1409_s19] sm:$0xff]  ;;  %v1441_v9 = vld [vmem:[%s1409_s19 + $0x8] sm:$0xff]  ;;  %s196_s12 = scalar_lea.vmem [#allocation5], %s967_s30  ;;  %vm793_vm2 = vcmask 1041408   ;;  %s811_s16 = scalar_lea.sflag [#allocation4], %s1405_s15 }
  0x27   : > { %v266_v7 = vmax.f32 %v1427_v4, %v1430_v5  ;;  %v1444_v10 = vld [vmem:[%s1409_s19 + $0x10] sm:$0xff]  ;;  %v275_v11 = vmax.f32 %v274_v3, %v1422_v2  ;;  %v258_v12 = vmax.f32 %v1438_v8, %v1441_v9  ;;  %v1450_v13 = vld [vmem:[%s1409_s19 + $0x78] sm:$0xff]  ;;  %v1453_v14 = vld [vmem:[%s1409_s19 + $0x80] sm:$0xff]  ;;  %s2210_s21 = smov (!%p1928_p3, %s960_s21), 47  ;;  %s827_s6 = scalar_lea.hbm %s2116_s2, %s970_s3 }
  0x28   : > { %v1457_v16 = vld [vmem:[%s1409_s19 + $0x48] sm:$0xff]  ;;  %v1460_v17 = vld [vmem:[%s1409_s19 + $0x50] sm:$0xff]  ;;  %v278_v19 = vmax.f32 %v1450_v13, %v1453_v14  ;;  %v1466_v20 = vld [vmem:[%s1409_s19 + $0x18] sm:$0xff]  ;;  %s961_s26 = sshll.u32 %s2210_s21, 3  ;;  %s829_s7 = sshll.u32 %s196_s12, 4  ;;  %s830_s7 = int_to_ptr.vmem [resolvable:$true] %s829_s7 }
  0x29   : > { %v267_v15 = vmax.f32 %v266_v7, %v1433_v6  ;;  %276 = vmax.xlane.f32.xlu2 %v275_v11  ;;  %v259_v18 = vmax.f32 %v258_v12, %v1444_v10  ;;  %v1469_v21 = vld [vmem:[%s1409_s19 + $0x20] sm:$0xff]  ;;  %v1472_v22 = vld [vmem:[%s1409_s19 + $0x88] sm:$0xff]  ;;  %v270_v23 = vmax.f32 %v1457_v16, %v1460_v17  ;;  %v1477_v24 = vld [vmem:[%s1409_s19 + $0x58] sm:$0xff]  ;;  %s1967_s29 = scalar_lea.vmem %s2115_s1, %s961_s26  ;;  %s831_s8 = sshll.u32 %s827_s6, 4  ;;  %s832_s8 = int_to_ptr.hbm [resolvable:$true] %s831_s8 }
  0x2a   : > { %v262_v25 = vmax.f32 %v1466_v20, %v1469_v21  ;;  %v1482_v26 = vld [vmem:[%s1409_s19 + $0x28] sm:$0xff]  ;;  %v279_v27 = vmax.f32 %v278_v19, %v1472_v22  ;;  %v1487_v29 = vld [vmem:[%s1409_s19 + $0xc0] sm:$0xff]  ;;  %v1497_v33 = vld [vmem:[%s1409_s19 + $0xb0] sm:$0xff]  ;;  %s1245_s18 = sshra.s32 %s832_s8, 4  ;;  %s1251_s25 = scalar_lea.hbm %s2116_s2, 9  ;;  %s1246_s18 = int_to_ptr.hbm [resolvable:$true] %s1245_s18 }
  0x2b   : > { %268 = vmax.xlane.f32.xlu1 %v267_v15  ;;  %260 = vmax.xlane.f32.xlu0 %v259_v18  ;;  %v271_v28 = vmax.f32 %v270_v23, %v1477_v24  ;;  %v1490_v30 = vld [vmem:[%s1409_s19 + $0xc8] sm:$0xff]  ;;  %v1500_v34 = vld [vmem:[%s1409_s19 + $0x90] sm:$0xff]  ;;  %v1503_v35 = vld [vmem:[%s1409_s19 + $0x98] sm:$0xff]  ;;  %p1252_p7 = scmp.lt.s32.totalorder %s1246_s18, %s2116_s2 }
  0x2c   : > { %v263_v31 = vmax.f32 %v262_v25, %v1482_v26  ;;  %v1494_v32 = vld [vmem:[%s1409_s19 + $0xa8] sm:$0xff]  ;;  %v290_v36 = vmax.f32 %v1487_v29, %v1490_v30  ;;  %v1508_v37 = vld [vmem:[%s1409_s19 + $0xd0] sm:$0xff]  ;;  %v1513_v39 = vld [vmem:[%s1409_s19 + $0xb8] sm:$0xff]  ;;  %v282_v40 = vmax.f32 %v1500_v34, %v1503_v35 }
  0x2d   : > { %v286_v38 = vmax.f32 %v1494_v32, %v1497_v33  ;;  %v1518_v41 = vld [vmem:[%s1409_s19 + $0xa0] sm:$0xff]  ;;  %v1523_v44 = vld [vmem:[%s1409_s19 + $0x108] sm:$0xff]  ;;  %v1526_v45 = vld [vmem:[%s1409_s19 + $0x110] sm:$0xff] }
  0x2e   : > { %v291_v42 = vmax.f32 %v290_v36, %v1508_v37  ;;  %v283_v46 = vmax.f32 %v282_v40, %v1518_v41  ;;  %v1530_v47 = vld [vmem:[%s1409_s19 + $0xf0] sm:$0xff]  ;;  %v1533_v48 = vld [vmem:[%s1409_s19 + $0xf8] sm:$0xff]  ;;  %v1539_v50 = vld [vmem:[%s1409_s19 + $0xe0] sm:$0xff]  ;;  %v302_v51 = vmax.f32 %v1523_v44, %v1526_v45 }
  0x2f   : > { %v287_v43 = vmax.f32 %v286_v38, %v1513_v39  ;;  %v1536_v49 = vld [vmem:[%s1409_s19 + $0xd8] sm:$0xff]  ;;  %v298_v53 = vmax.f32 %v1530_v47, %v1533_v48  ;;  %v1549_v54 = vld [vmem:[%s1409_s19 + $0x100] sm:$0xff]  ;;  %v1554_v56 = vld [vmem:[%s1409_s19 + $0xe8] sm:$0xff] }
  0x30   : > { %v1544_v52 = vld [vmem:[%s1409_s19 + $0x118] sm:$0xff]  ;;  %v294_v55 = vmax.f32 %v1536_v49, %v1539_v50  ;;  %v1559_v59 = vld [vmem:[%s1409_s19 + $0x150] sm:$0xff]  ;;  %v1569_v63 = vld [vmem:[%s1409_s19 + $0x140] sm:$0xff] }
  0x31   : > { %280 = vmax.xlane.f32.xlu2 %v279_v27  ;;  %v303_v57 = vmax.f32 %v302_v51, %v1544_v52  ;;  %v299_v58 = vmax.f32 %v298_v53, %v1549_v54  ;;  %v1562_v60 = vld [vmem:[%s1409_s19 + $0x158] sm:$0xff]  ;;  %v1572_v3 = vld [vmem:[%s1409_s19 + $0x120] sm:$0xff]  ;;  %v1575_v7 = vld [vmem:[%s1409_s19 + $0x128] sm:$0xff] }
  0x32   : > { %v295_v61 = vmax.f32 %v294_v55, %v1554_v56  ;;  %v1566_v62 = vld [vmem:[%s1409_s19 + $0x138] sm:$0xff]  ;;  %v314_v11 = vmax.f32 %v1559_v59, %v1562_v60  ;;  %v1580_v12 = vld [vmem:[%s1409_s19 + $0x160] sm:$0xff]  ;;  %v1585_v18 = vld [vmem:[%s1409_s19 + $0x148] sm:$0xff]  ;;  %v306_v19 = vmax.f32 %v1572_v3, %v1575_v7 }
  0x33   : > { %272 = vmax.xlane.f32.xlu1 %v271_v28  ;;  %264 = vmax.xlane.f32.xlu0 %v263_v31  ;;  %v310_v15 = vmax.f32 %v1566_v62, %v1569_v63  ;;  %v1590_v23 = vld [vmem:[%s1409_s19 + $0x130] sm:$0xff]  ;;  %v1596_v31 = vld [vmem:[%s1409_s19 + $0x168] sm:$0xff]  ;;  %v1604_v40 = vld [vmem:[%s1409_s19 + $0x178] sm:$0xff] }
  0x34   : > { %v315_v25 = vmax.f32 %v314_v11, %v1580_v12  ;;  %v307_v28 = vmax.f32 %v306_v19, %v1590_v23  ;;  %v1599_v36 = vld [vmem:[%s1409_s19 + $0x170] sm:$0xff]  ;;  %s1247_s19 = scalar_lea.hbm %s1246_s18, 3 }
  0x35   : > { %v311_v27 = vmax.f32 %v310_v15, %v1585_v18  ;;  %v318_v38 = vmax.f32 %v1596_v31, %v1599_v36  ;;  %p1248_p4 = scmp.ne.s32.totalorder %s1246_s18, %s1247_s19  ;;  %p1253_p8 = scmp.lt.s32.totalorder %s1251_s25, %s1247_s19 }
  0x37   : > { %p1249_p5 = pnand %p1248_p4, %p1383_p9  ;;  %p1254_p10 = por %p1253_p8, %p1252_p7 }
  0x39   : > { %292 = vmax.xlane.f32.xlu2 %v291_v42  ;;  %v319_v42 = vmax.f32 %v318_v38, %v1604_v40  ;;  %p1250_p6 = pneg %p1249_p5 }
  0x3b   : > { %288 = vmax.xlane.f32.xlu1 %v287_v43  ;;  %284 = vmax.xlane.f32.xlu0 %v283_v46  ;;  %p1255_p12 = pnand %p1254_p10, %p1250_p6 }
  0x41   : > { %304 = vmax.xlane.f32.xlu2 %v303_v57 }
  0x43   : > { %300 = vmax.xlane.f32.xlu1 %v299_v58  ;;  %296 = vmax.xlane.f32.xlu0 %v295_v61 }
  0x49   : > { %316 = vmax.xlane.f32.xlu2 %v315_v25 }
  0x4b   : > { %312 = vmax.xlane.f32.xlu1 %v311_v27  ;;  %308 = vmax.xlane.f32.xlu0 %v307_v28 }
  0x53   : > { %320 = vmax.xlane.f32.xlu0 %v319_v42 }
  0x9c   : > { %v1607_v43 = vpop.xlane.xlu2 %276 }
  0x9e   : > { %v1609_v46 = vpop.xlane.xlu1 %268  ;;  %v1611_v51 = vpop.xlane.xlu0 %260 }
  0x9f   : > { %v350_v53 = vsub.f32 %v1427_v4, %v1609_v46  ;;  %v351_v55 = vsub.f32 %v1430_v5, %v1609_v46  ;;  %v352_v57 = vsub.f32 %v1433_v6, %v1609_v46  ;;  %v344_v58 = vsub.f32 %v1438_v8, %v1611_v51 }
  0xa0   : > { %v345_v61 = vsub.f32 %v1441_v9, %v1611_v51  ;;  %v346_v25 = vsub.f32 %v1444_v10, %v1611_v51 }
  0xa1   : > { %v404_v11 = vmul.f32 1.442695, %v350_v53  ;;  %v406_v15 = vmul.f32 1.442695, %v351_v55  ;;  %v408_v19 = vmul.f32 1.442695, %v352_v57 }
  0xa2   : > { %v392_v27 = vmul.f32 1.442695, %v344_v58  ;;  %v394_v4 = vmul.f32 1.442695, %v345_v61  ;;  %v396_v6 = vmul.f32 1.442695, %v346_v25 }
  0xa3   : > { %1035 = vpow2.f32 %v404_v11 }
  0xa4   : > { %1037 = vpow2.f32 %v406_v15  ;;  %v1625_v5 = vpop.xlane.xlu2 %280 }
  0xa5   : > { %1039 = vpow2.f32 %v408_v19  ;;  %v359_v8 = vsub.f32 %v1450_v13, %v1625_v5  ;;  %v360_v9 = vsub.f32 %v1453_v14, %v1625_v5  ;;  %v361_v10 = vsub.f32 %v1472_v22, %v1625_v5 }
  0xa6   : > { %v1627_v28 = vpop.xlane.xlu1 %272  ;;  %1041 = vpow2.f32 %v392_v27  ;;  %v1635_v38 = vpop.xlane.xlu0 %264 }
  0xa7   : > { %1043 = vpow2.f32 %v394_v4  ;;  %v353_v42 = vsub.f32 %v1457_v16, %v1627_v28  ;;  %v354_v53 = vsub.f32 %v1460_v17, %v1627_v28  ;;  %v355_v55 = vsub.f32 %v1477_v24, %v1627_v28 }
  0xa8   : > { %v422_v57 = vmul.f32 1.442695, %v359_v8  ;;  %v424_v13 = vmul.f32 1.442695, %v360_v9  ;;  %1045 = vpow2.f32 %v396_v6  ;;  %v426_v14 = vmul.f32 1.442695, %v361_v10 }
  0xa9   : > { %v1643_v58 = vpop.eup %1035  ;;  %v410_v61 = vmul.f32 1.442695, %v353_v42  ;;  %v347_v22 = vsub.f32 %v1466_v20, %v1635_v38  ;;  %v412_v16 = vmul.f32 1.442695, %v354_v53  ;;  %v348_v17 = vsub.f32 %v1469_v21, %v1635_v38 }
  0xaa   : > { %v1647_v11 = vpop.eup %1037  ;;  %1047 = vpow2.f32 %v422_v57  ;;  %v349_v24 = vsub.f32 %v1482_v26, %v1635_v38  ;;  %v414_v25 = vmul.f32 1.442695, %v355_v55  ;;  %v356_v20 = vsub.f32 %v1416_v0, %v1607_v43 }
  0xab   : > { %v1653_v15 = vpop.eup %1039  ;;  %v496_v19 = vadd.f32 %v1647_v11, %v1643_v58  ;;  %1049 = vpow2.f32 %v424_v13  ;;  %v398_v4 = vmul.f32 1.442695, %v347_v22  ;;  %v357_v21 = vsub.f32 %v1419_v1, %v1607_v43 }
  0xac   : > { %v1659_v27 = vpop.eup %1041  ;;  %1051 = vpow2.f32 %v426_v14  ;;  %v358_v26 = vsub.f32 %v1422_v2, %v1607_v43  ;;  %v322_v8 = vmax.f32 %v1611_v51, %v1607_v43  ;;  %v1669_v9 = vpop.xlane.xlu2 %292  ;;  %v400_v0 = vmul.f32 1.442695, %v348_v17 }
  0xad   : > { %v1665_v6 = vpop.eup %1043  ;;  %v497_v10 = vadd.f32 %v1653_v15, %v496_v19  ;;  %1053 = vpow2.f32 %v410_v61  ;;  %v402_v53 = vmul.f32 1.442695, %v349_v24  ;;  %v368_v1 = vsub.f32 %v1487_v29, %v1669_v9 }
  0xae   : > { %v488_v42 = vadd.f32 %v1665_v6, %v1659_v27  ;;  %1055 = vpow2.f32 %v412_v16  ;;  %v1676_v2 = vpop.eup %1045  ;;  %v1678_v55 = vpop.xlane.xlu1 %288  ;;  %v369_v13 = vsub.f32 %v1490_v30, %v1669_v9  ;;  %v370_v14 = vsub.f32 %v1508_v37, %v1669_v9 }
  0xaf   : > { %2148 = vst [vmem:[#allocation8_spill] sm:$0xff] %v1678_v55  ;;  %498 = vadd.xlane.f32.xlu0 %v497_v10  ;;  %v1680_v57 = vpop.xlane.xlu0 %284  ;;  %1057 = vpow2.f32 %v414_v25  ;;  %v416_v61 = vmul.f32 1.442695, %v356_v20  ;;  %v440_v29 = vmul.f32 1.442695, %v368_v1 }
  0xb0   : > { %2149 = vst [vmem:[#allocation9_spill] sm:$0xff] %v1680_v57  ;;  %v1686_v22 = vpop.eup %1047  ;;  %v489_v16 = vadd.f32 %v1676_v2, %v488_v42  ;;  %1059 = vpow2.f32 %v398_v4  ;;  %v418_v17 = vmul.f32 1.442695, %v357_v21  ;;  %v442_v19 = vmul.f32 1.442695, %v369_v13 }
  0xb1   : > { %2150 = vst [vmem:[#allocation10_spill] sm:$0xff] %v1686_v22  ;;  %v1689_v24 = vpop.eup %1049  ;;  %1061 = vpow2.f32 %v400_v0  ;;  %v444_v10 = vmul.f32 1.442695, %v370_v14  ;;  %v362_v25 = vsub.f32 %v1500_v34, %v1680_v57  ;;  %v420_v20 = vmul.f32 1.442695, %v358_v26 }
  0xb2   : > { %2151 = vst [vmem:[#allocation11_spill] sm:$0xff] %v1689_v24  ;;  %v1693_v30 = vpop.eup %1051  ;;  %490 = vadd.xlane.f32.xlu1 %v489_v16  ;;  %v508_v37 = vadd.f32 %v1689_v24, %v1686_v22  ;;  %1063 = vpow2.f32 %v402_v53  ;;  %v363_v4 = vsub.f32 %v1503_v35, %v1680_v57  ;;  %v1704_v42 = vmax.f32 %v322_v8, %v1669_v9 }
  0xb3   : > { %2152 = vst [vmem:[#allocation12_spill] sm:$0xff] %v1693_v30  ;;  %v1699_v21 = vpop.eup %1053  ;;  %1065 = vpow2.f32 %v440_v29  ;;  %v364_v34 = vsub.f32 %v1518_v41, %v1680_v57  ;;  %v325_v26 = vmax.f32 %v1627_v28, %v1678_v55  ;;  %v428_v35 = vmul.f32 1.442695, %v362_v25 }
  0xb4   : > { %v1708_v1 = vpop.eup %1055  ;;  %v509_v53 = vadd.f32 %v1693_v30, %v508_v37  ;;  %1067 = vpow2.f32 %v442_v19  ;;  %v1715_v14 = vpop.xlane.xlu2 %304  ;;  %v365_v41 = vsub.f32 %v1494_v32, %v1678_v55  ;;  %v366_v16 = vsub.f32 %v1497_v33, %v1678_v55 }
  0xb5   : > { %v1713_v13 = vpop.eup %1057  ;;  %2154 = vst [vmem:[#allocation14_spill] sm:$0xff] %v1715_v14  ;;  %v500_v8 = vadd.f32 %v1708_v1, %v1699_v21  ;;  %1069 = vpow2.f32 %v444_v10  ;;  %v430_v37 = vmul.f32 1.442695, %v363_v4  ;;  %v377_v19 = vsub.f32 %v1523_v44, %v1715_v14 }
  0xb6   : > { %2153 = vst [vmem:[#allocation13_spill] sm:$0xff] %v1713_v13  ;;  %v1723_v29 = vpop.eup %1059  ;;  %1071 = vpow2.f32 %v416_v61  ;;  %v378_v25 = vsub.f32 %v1526_v45, %v1715_v14  ;;  %v432_v32 = vmul.f32 1.442695, %v364_v34  ;;  %v379_v33 = vsub.f32 %v1544_v52, %v1715_v14 }
  0xb7   : > { %v1729_v0 = vpop.eup %1061  ;;  %510 = vadd.xlane.f32.xlu0 %v509_v53  ;;  %v501_v10 = vadd.f32 %v1713_v13, %v500_v8  ;;  %v1732_v30 = vpop.xlane.xlu0 %296  ;;  %1073 = vpow2.f32 %v418_v17  ;;  %v458_v4 = vmul.f32 1.442695, %v377_v19  ;;  %v367_v45 = vsub.f32 %v1513_v39, %v1678_v55 }
  0xb8   : > { %2155 = vst [vmem:[#allocation15_spill] sm:$0xff] %v1732_v30  ;;  %v1736_v61 = vpop.eup %1063  ;;  %v492_v44 = vadd.f32 %v1729_v0, %v1723_v29  ;;  %1075 = vpow2.f32 %v420_v20  ;;  %v324_v8 = vmax.f32 %v1609_v46, %v1680_v57  ;;  %v1746_v17 = vpop.xlane.xlu1 %300  ;;  %v460_v34 = vmul.f32 1.442695, %v378_v25 }
  0xb9   : > { %v1742_v53 = vpop.eup %1065  ;;  %2157 = vst [vmem:[#allocation17_spill] sm:$0xff] %v1746_v17  ;;  %1077 = vpow2.f32 %v428_v35  ;;  %v434_v52 = vmul.f32 1.442695, %v365_v41  ;;  %v462_v20 = vmul.f32 1.442695, %v379_v33  ;;  %v371_v39 = vsub.f32 %v1536_v49, %v1732_v30 }
  0xba   : > { %2156 = vst [vmem:[#allocation16_spill] sm:$0xff] %v1742_v53  ;;  %v1748_v24 = vpop.eup %1067  ;;  %502 = vadd.xlane.f32.xlu1 %v501_v10  ;;  %v493_v22 = vadd.f32 %v1736_v61, %v492_v44  ;;  %1079 = vpow2.f32 %v430_v37  ;;  %v1756_v13 = vmax.f32 %v325_v26, %v1715_v14  ;;  %v372_v41 = vsub.f32 %v1539_v50, %v1732_v30 }
  0xbb   : > { %2158 = vst [vmem:[#allocation18_spill] sm:$0xff] %v1748_v24  ;;  %v1753_v19 = vpop.eup %1069  ;;  %v520_v35 = vadd.f32 %v1748_v24, %v1742_v53  ;;  %1081 = vpow2.f32 %v432_v32  ;;  %v436_v37 = vmul.f32 1.442695, %v366_v16  ;;  %v438_v10 = vmul.f32 1.442695, %v367_v45 }
  0xbc   : > { %2159 = vst [vmem:[#allocation19_spill] sm:$0xff] %v1753_v19  ;;  %v1762_v25 = vpop.eup %1071  ;;  %494 = vadd.xlane.f32.xlu2 %v493_v22  ;;  %1083 = vpow2.f32 %v458_v4  ;;  %v373_v49 = vsub.f32 %v1554_v56, %v1732_v30  ;;  %v1768_v26 = vpop.xlane.xlu2 %316  ;;  %v446_v32 = vmul.f32 1.442695, %v371_v39  ;;  %v374_v50 = vsub.f32 %v1530_v47, %v1746_v17 }
  0xbd   : > { %v1766_v33 = vpop.eup %1073  ;;  %2160 = vst [vmem:[#allocation20_spill] sm:$0xff] %v1768_v26  ;;  %v521_v44 = vadd.f32 %v1753_v19, %v520_v35  ;;  %1085 = vpow2.f32 %v460_v34  ;;  %v386_v56 = vsub.f32 %v1559_v59, %v1768_v26  ;;  %v387_v16 = vsub.f32 %v1562_v60, %v1768_v26 }
  0xbe   : > { %v1773_v24 = vpop.eup %1075  ;;  %v504_v22 = vadd.f32 %v1766_v33, %v1762_v25  ;;  %1087 = vpow2.f32 %v462_v20  ;;  %v1784_v45 = vmax.f32 %v324_v8, %v1746_v17  ;;  %v448_v47 = vmul.f32 1.442695, %v372_v41 }
  0xbf   : > { %v1781_v4 = vpop.eup %1077  ;;  %522 = vadd.xlane.f32.xlu0 %v521_v44  ;;  %v1786_v34 = vpop.xlane.xlu0 %308  ;;  %1089 = vpow2.f32 %v434_v52  ;;  %v388_v39 = vsub.f32 %v1580_v12, %v1768_v26  ;;  %v450_v59 = vmul.f32 1.442695, %v373_v49  ;;  %v375_v60 = vsub.f32 %v1533_v48, %v1746_v17 }
  0xc0   : > { %2161 = vst [vmem:[#allocation21_spill] sm:$0xff] %v1786_v34  ;;  %v1790_v20 = vpop.eup %1079  ;;  %1091 = vpow2.f32 %v436_v37  ;;  %v376_v35 = vsub.f32 %v1549_v54, %v1746_v17  ;;  %v476_v52 = vmul.f32 1.442695, %v386_v56  ;;  %v452_v41 = vmul.f32 1.442695, %v374_v50  ;;  %v1807_v54 = vpop.xlane.xlu1 %312 }
  0xc1   : > { %2162 = vst [vmem:[#allocation22_spill] sm:$0xff] %v1790_v20  ;;  %v1796_v8 = vpop.eup %1081  ;;  %v512_v44 = vadd.f32 %v1790_v20, %v1781_v4  ;;  %1093 = vpow2.f32 %v438_v10  ;;  %v505_v12 = vadd.f32 %v1773_v24, %v504_v22  ;;  %v478_v37 = vmul.f32 1.442695, %v387_v16 }
  0xc2   : > { %v1800_v19 = vpop.eup %1083  ;;  %1095 = vpow2.f32 %v446_v32  ;;  %v380_v48 = vsub.f32 %v1572_v3, %v1786_v34  ;;  %2165 = vst [vmem:[#allocation25_spill] sm:$0xff] %v1807_v54  ;;  %v480_v20 = vmul.f32 1.442695, %v388_v39  ;;  %v381_v10 = vsub.f32 %v1575_v7, %v1786_v34 }
  0xc3   : > { %2163 = vst [vmem:[#allocation23_spill] sm:$0xff] %v1800_v19  ;;  %v1805_v49 = vpop.eup %1085  ;;  %v513_v53 = vadd.f32 %v1796_v8, %v512_v44  ;;  %1097 = vpow2.f32 %v448_v47  ;;  %v382_v3 = vsub.f32 %v1590_v23, %v1786_v34  ;;  %v383_v22 = vsub.f32 %v1566_v62, %v1807_v54 }
  0xc4   : > { %2164 = vst [vmem:[#allocation24_spill] sm:$0xff] %v1805_v49  ;;  %v1812_v50 = vpop.eup %1087  ;;  %506 = vadd.xlane.f32.xlu2 %v505_v12  ;;  %v532_v32 = vadd.f32 %v1805_v49, %v1800_v19  ;;  %1099 = vpow2.f32 %v450_v59  ;;  %v2166_v16 = vmax.f32 %v1635_v38, %v1625_v5  ;;  %v454_v47 = vmul.f32 1.442695, %v375_v60 }
  0xc5   : > { %v1820_v56 = vpop.eup %1089  ;;  %514 = vadd.xlane.f32.xlu1 %v513_v53  ;;  %1101 = vpow2.f32 %v476_v52  ;;  %v384_v39 = vsub.f32 %v1569_v63, %v1807_v54  ;;  %v456_v44 = vmul.f32 1.442695, %v376_v35  ;;  %v464_v62 = vmul.f32 1.442695, %v380_v48 }
  0xc6   : > { %v327_v7 = vmax.f32 %v2166_v16, %v1732_v30  ;;  %v1828_v59 = vpop.eup %1091  ;;  %v533_v23 = vadd.f32 %v1812_v50, %v532_v32  ;;  %1103 = vpow2.f32 %v478_v37  ;;  %v466_v53 = vmul.f32 1.442695, %v381_v10 }
  0xc7   : > { %v1831_v12 = vpop.eup %1093  ;;  %v516_v49 = vadd.f32 %v1828_v59, %v1820_v56  ;;  %v1835_v19 = vpop.xlane.xlu0 %320  ;;  %1105 = vpow2.f32 %v480_v20  ;;  %v385_v60 = vsub.f32 %v1585_v18, %v1807_v54  ;;  %v468_v52 = vmul.f32 1.442695, %v382_v3 }
  0xc8   : > { %2167 = vst [vmem:[#allocation26_spill] sm:$0xff] %v1835_v19  ;;  %v1839_v63 = vpop.eup %1095  ;;  %534 = vadd.xlane.f32.xlu0 %v533_v23  ;;  %1107 = vpow2.f32 %v452_v41  ;;  %v470_v37 = vmul.f32 1.442695, %v383_v22  ;;  %v389_v35 = vsub.f32 %v1596_v31, %v1835_v19  ;;  %v472_v32 = vmul.f32 1.442695, %v384_v39 }
  0xc9   : > { %v1843_v48 = vpop.eup %1097  ;;  %1109 = vpow2.f32 %v454_v47  ;;  %v330_v20 = vmax.f32 %v1704_v42, %v1786_v34  ;;  %v331_v10 = vmax.f32 %v327_v7, %v1807_v54  ;;  %v517_v18 = vadd.f32 %v1831_v12, %v516_v49 }
  0xca   : > { %v1848_v16 = vpop.eup %1099  ;;  %v524_v41 = vadd.f32 %v1843_v48, %v1839_v63  ;;  %1111 = vpow2.f32 %v456_v44  ;;  %v390_v31 = vsub.f32 %v1599_v36, %v1835_v19  ;;  %v474_v22 = vmul.f32 1.442695, %v385_v60 }
  0xcb   : > { %v1855_v3 = vpop.eup %1101  ;;  %1113 = vpow2.f32 %v464_v62  ;;  %v332_v42 = vmax.f32 %v1784_v45, %v1768_v26  ;;  %v333_v7 = vmax.f32 %v1756_v13, %v1835_v19  ;;  %v391_v39 = vsub.f32 %v1604_v40, %v1835_v19 }
  0xcc   : > { %2168 = vst [vmem:[#allocation27_spill] sm:$0xff] %v1855_v3  ;;  %v1861_v47 = vpop.eup %1103  ;;  %518 = vadd.xlane.f32.xlu2 %v517_v18  ;;  %v525_v49 = vadd.f32 %v1848_v16, %v524_v41  ;;  %1115 = vpow2.f32 %v466_v53  ;;  %v482_v36 = vmul.f32 1.442695, %v389_v35  ;;  %v334_v45 = vmax.f32 %v330_v20, %v331_v10 }
  0xcd   : > { %2169 = vst [vmem:[#allocation28_spill] sm:$0xff] %v1861_v47  ;;  %v1866_v23 = vpop.eup %1105  ;;  %v544_v44 = vadd.f32 %v1861_v47, %v1855_v3  ;;  %1117 = vpow2.f32 %v468_v52  ;;  %v335_v62 = vmax.f32 %v332_v42, %v333_v7  ;;  %v484_v13 = vmul.f32 1.442695, %v390_v31 }
  0xce   : > { %2170 = vst [vmem:[#allocation29_spill] sm:$0xff] %v1866_v23  ;;  %v1870_v60 = vpop.eup %1107  ;;  %526 = vadd.xlane.f32.xlu1 %v525_v49  ;;  %1119 = vpow2.f32 %v470_v37  ;;  %v486_v52 = vmul.f32 1.442695, %v391_v39 }
  0xcf   : > { %v1872_v18 = vpop.eup %1109  ;;  %v545_v53 = vadd.f32 %v1866_v23, %v544_v44  ;;  %1121 = vpow2.f32 %v472_v32  ;;  %v336_v40 = vmax.f32 %v334_v45, %v335_v62 }
  0xd0   : > { %v1875_v35 = vpop.eup %1111  ;;  %v528_v41 = vadd.f32 %v1872_v18, %v1870_v60  ;;  %1123 = vpow2.f32 %v474_v22 }
  0xd1   : > { %v1879_v20 = vpop.eup %1113  ;;  %546 = vadd.xlane.f32.xlu0 %v545_v53  ;;  %1125 = vpow2.f32 %v482_v36  ;;  %v337_v10 = vrot.slane %v336_v40, 4 }
  0xd2   : > { %v1881_v37 = vpop.eup %1115  ;;  %v529_v31 = vadd.f32 %v1875_v35, %v528_v41  ;;  %1127 = vpow2.f32 %v484_v13 }
  0xd3   : > { %v1884_v42 = vpop.eup %1117  ;;  %v536_v32 = vadd.f32 %v1881_v37, %v1879_v20  ;;  %v338_v7 = vmax.f32 %v336_v40, %v337_v10  ;;  %1129 = vpow2.f32 %v486_v52 }
  0xd4   : > { %v1888_v49 = vpop.eup %1119  ;;  %530 = vadd.xlane.f32.xlu2 %v529_v31 }
  0xd5   : > { %v1890_v22 = vpop.eup %1121  ;;  %v537_v39 = vadd.f32 %v1884_v42, %v536_v32  ;;  %v339_v36 = vrot.slane %v338_v7, 2 }
  0xd6   : > { %v1893_v44 = vpop.eup %1123  ;;  %v540_v45 = vadd.f32 %v1890_v22, %v1888_v49 }
  0xd7   : > { %v1897_v62 = vpop.eup %1125  ;;  %538 = vadd.xlane.f32.xlu1 %v537_v39  ;;  %v340_v13 = vmax.f32 %v338_v7, %v339_v36 }
  0xd8   : > { %2171 = vst [vmem:[#allocation30_spill] sm:$0xff] %v1897_v62  ;;  %v1899_v53 = vpop.eup %1127  ;;  %v541_v10 = vadd.f32 %v1893_v44, %v540_v45 }
  0xd9   : > { %2172 = vst [vmem:[#allocation31_spill] sm:$0xff] %v1899_v53  ;;  %v548_v40 = vadd.f32 %v1899_v53, %v1897_v62  ;;  %v341_v41 = vrot.slane %v340_v13, 1  ;;  %v1903_v52 = vpop.eup %1129 }
  0xda   : > { %2173 = vst [vmem:[#allocation32_spill] sm:$0xff] %v1903_v52 }
  0xdb   : > { %v549_v31 = vadd.f32 %v1903_v52, %v548_v40  ;;  %v342_v32 = vmax.f32 %v340_v13, %v341_v41 }
  0xdc   : > { %542 = vadd.xlane.f32.xlu2 %v541_v10 }
  0xdd   : > { %968 = vpush %v342_v32 }
  0xdf   : > { %550 = vadd.xlane.f32.xlu1 %v549_v31 }
 0x10e   : > { %s969_s20 = spop %968 }
 0x10f   : > { %v1907_v39 = vstv %s969_s20 }
 0x110   : > { %2174 = vst [vmem:[#allocation33_spill] sm:$0xff] %v1907_v39  ;;  %v618_v7 = vsub.f32 %v1611_v51, %v1907_v39  ;;  %v619_v36 = vsub.f32 %v1635_v38, %v1907_v39  ;;  %v620_v45 = vsub.f32 %v1609_v46, %v1907_v39  ;;  %v621_v13 = vsub.f32 %v1627_v28, %v1907_v39 }
 0x111   : > { %v622_v40 = vsub.f32 %v1607_v43, %v1907_v39  ;;  %v623_v41 = vsub.f32 %v1625_v5, %v1907_v39  ;;  %v624_v31 = vsub.f32 %v1680_v57, %v1907_v39  ;;  %v626_v62 = vsub.f32 %v1669_v9, %v1907_v39 }
 0x112   : > { %v634_v53 = vmul.f32 1.442695, %v618_v7  ;;  %v636_v23 = vmul.f32 1.442695, %v619_v36  ;;  %v638_v10 = vmul.f32 1.442695, %v620_v45  ;;  %v625_v7 = vsub.f32 %v1678_v55, %v1907_v39 }
 0x113   : > { %v640_v32 = vmul.f32 1.442695, %v621_v13  ;;  %v642_v36 = vmul.f32 1.442695, %v622_v40  ;;  %v644_v52 = vmul.f32 1.442695, %v623_v41  ;;  %v628_v13 = vsub.f32 %v1746_v17, %v1907_v39 }
 0x114   : > { %1131 = vpow2.f32 %v634_v53  ;;  %v646_v53 = vmul.f32 1.442695, %v624_v31  ;;  %v648_v40 = vmul.f32 1.442695, %v625_v7  ;;  %v630_v55 = vsub.f32 %v1786_v34, %v1907_v39 }
 0x115   : > { %1133 = vpow2.f32 %v636_v23  ;;  %v627_v23 = vsub.f32 %v1732_v30, %v1907_v39  ;;  %v631_v57 = vsub.f32 %v1807_v54, %v1907_v39  ;;  %v632_v31 = vsub.f32 %v1768_v26, %v1907_v39 }
 0x116   : > { %1135 = vpow2.f32 %v638_v10  ;;  %v629_v10 = vsub.f32 %v1715_v14, %v1907_v39  ;;  %v650_v7 = vmul.f32 1.442695, %v626_v62 }
 0x117   : > { %1137 = vpow2.f32 %v640_v32  ;;  %v633_v32 = vsub.f32 %v1835_v19, %v1907_v39  ;;  %v1956_v14 = vmul.f32 1.442695, %v632_v31 }
 0x118   : > { %1139 = vpow2.f32 %v642_v36  ;;  %v652_v36 = vmul.f32 1.442695, %v627_v23  ;;  %v656_v62 = vmul.f32 1.442695, %v629_v10 }
 0x119   : > { %1141 = vpow2.f32 %v644_v52 }
 0x11a   : > { %v1132_v47 = vpop.eup %1131 }
 0x11b   : > { %v1134_v45 = vpop.eup %1133  ;;  %v666_v34 = vmul.f32 %v1132_v47, %v1659_v27  ;;  %v667_v26 = vmul.f32 %v1132_v47, %v1665_v6  ;;  %v668_v19 = vmul.f32 %v1132_v47, %v1676_v2  ;;  %v658_v27 = vmul.f32 1.442695, %v630_v55 }
 0x11c   : > { %v669_v17 = vmul.f32 %v1134_v45, %v1723_v29  ;;  %v1136_v54 = vpop.eup %1135  ;;  %v670_v30 = vmul.f32 %v1134_v45, %v1729_v0  ;;  %v671_v23 = vmul.f32 %v1134_v45, %v1736_v61  ;;  %v660_v29 = vmul.f32 1.442695, %v631_v57 }
 0x11d   : > { %v1138_v39 = vpop.eup %1137  ;;  %v672_v6 = vmul.f32 %v1136_v54, %v1643_v58  ;;  %v673_v2 = vmul.f32 %v1136_v54, %v1647_v11  ;;  %v674_v61 = vmul.f32 %v1136_v54, %v1653_v15  ;;  %v2176_v15 = vld [vmem:[#allocation13_spill] sm:$0xff] }
 0x11e   : > { %v714_v0 = vadd.f32 %v669_v17, %v666_v34  ;;  %v735_v47 = vadd.f32 %v670_v30, %v667_v26  ;;  %v756_v31 = vadd.f32 %v671_v23, %v668_v19  ;;  %v675_v58 = vmul.f32 %v1138_v39, %v1699_v21 }
 0x11f   : > { %v676_v11 = vmul.f32 %v1138_v39, %v1708_v1  ;;  %v677_v30 = vmul.f32 %v1138_v39, %v2176_v15  ;;  %v2177_v1 = vld [vmem:[#allocation10_spill] sm:$0xff]  ;;  %v2178_v39 = vld [vmem:[#allocation11_spill] sm:$0xff] }
 0x120   : > { %v715_v10 = vadd.f32 %v714_v0, %v672_v6 }
 0x122   : > { %v499_v41 = vpop.xlane.xlu0 %498 }
 0x123   : > { %1143 = vlog2.f32 %v499_v41  ;;  %v654_v41 = vmul.f32 1.442695, %v628_v13  ;;  %v1959_v13 = vmul.f32 1.442695, %v633_v32 }
 0x124   : > { %1145 = vpow2.f32 %v646_v53  ;;  %v1140_v53 = vpop.eup %1139 }
 0x125   : > { %v491_v52 = vpop.xlane.xlu1 %490  ;;  %1147 = vpow2.f32 %v648_v40  ;;  %v1142_v3 = vpop.eup %1141  ;;  %v678_v19 = vmul.f32 %v1140_v53, %v1762_v25  ;;  %v679_v34 = vmul.f32 %v1140_v53, %v1766_v33  ;;  %v680_v21 = vmul.f32 %v1140_v53, %v1773_v24  ;;  %v2180_v24 = vld [vmem:[#allocation22_spill] sm:$0xff] }
 0x126   : > { %1149 = vlog2.f32 %v491_v52  ;;  %v716_v52 = vadd.f32 %v715_v10, %v675_v58 }
 0x127   : > { %1151 = vpow2.f32 %v650_v7 }
 0x128   : > { %1153 = vpow2.f32 %v652_v36  ;;  %v717_v0 = vadd.f32 %v716_v52, %v678_v19 }
 0x129   : > { %v1144_v40 = vpop.eup %1143  ;;  %1155 = vpow2.f32 %v654_v41  ;;  %v736_v41 = vadd.f32 %v735_v47, %v673_v2  ;;  %v2179_v47 = vld [vmem:[#allocation12_spill] sm:$0xff] }
 0x12a   : > { %v1146_v45 = vpop.eup %1145  ;;  %v557_v55 = vmul.f32 0.6931472, %v1144_v40  ;;  %v511_v57 = vpop.xlane.xlu0 %510  ;;  %1157 = vpow2.f32 %v656_v62  ;;  %v757_v62 = vadd.f32 %v756_v31, %v674_v61 }
 0x12b   : > { %v1148_v7 = vpop.eup %1147  ;;  %1159 = vlog2.f32 %v511_v57  ;;  %v737_v40 = vadd.f32 %v736_v41, %v676_v11  ;;  %v684_v57 = vmul.f32 %v1146_v45, %v1781_v4  ;;  %v685_v53 = vmul.f32 %v1146_v45, %v2180_v24 }
 0x12c   : > { %v1150_v17 = vpop.eup %1149  ;;  %v586_v26 = vadd.f32 %v557_v55, %v1609_v46  ;;  %1161 = vpow2.f32 %v658_v27  ;;  %v681_v46 = vmul.f32 %v1142_v3, %v2177_v1  ;;  %v682_v27 = vmul.f32 %v1142_v3, %v2178_v39 }
 0x12d   : > { %v1152_v54 = vpop.eup %1151  ;;  %v553_v32 = vmul.f32 0.6931472, %v1150_v17  ;;  %v503_v36 = vpop.xlane.xlu1 %502  ;;  %v758_v2 = vadd.f32 %v757_v62, %v677_v30  ;;  %v683_v55 = vmul.f32 %v1142_v3, %v2179_v47  ;;  %v686_v31 = vmul.f32 %v1146_v45, %v1796_v8 }
 0x12e   : > { %v1154_v23 = vpop.eup %1153  ;;  %603 = vst.msk [vmem:[%s1967_s29 + $0x10] sm:$0xff] %vm600_vm0, %v586_v26  ;;  %1163 = vlog2.f32 %v503_v36  ;;  %v718_v58 = vadd.f32 %v717_v0, %v681_v46  ;;  %v687_v26 = vmul.f32 %v1148_v7, %v1820_v56  ;;  %v688_v4 = vmul.f32 %v1148_v7, %v1828_v59  ;;  %v2182_v59 = vld [vmem:[#allocation18_spill] sm:$0xff]  ;;  %v2183_v46 = vld [vmem:[#allocation19_spill] sm:$0xff] }
 0x12f   : > { %v1980_v25 = vpop.eup %1155  ;;  %v584_v33 = vadd.f32 %v553_v32, %v1611_v51  ;;  %v495_v6 = vpop.xlane.xlu2 %494  ;;  %v738_v51 = vadd.f32 %v737_v40, %v679_v34  ;;  %v759_v15 = vadd.f32 %v758_v2, %v680_v21  ;;  %v689_v45 = vmul.f32 %v1148_v7, %v1831_v12  ;;  %v2181_v34 = vld [vmem:[#allocation16_spill] sm:$0xff] }
 0x130   : > { %v1983_v61 = vpop.eup %1157  ;;  %1165 = vlog2.f32 %v495_v6  ;;  %v719_v3 = vadd.f32 %v718_v58, %v684_v57  ;;  %v690_v52 = vmul.f32 %v1152_v54, %v2181_v34  ;;  %v691_v1 = vmul.f32 %v1152_v54, %v2182_v59  ;;  %v2188_v59 = vld [vmem:[#allocation28_spill] sm:$0xff] }
 0x131   : > { %v1160_v10 = vpop.eup %1159  ;;  %601 = vst.msk [vmem:[%s1967_s29] sm:$0xff] %vm600_vm0, %v584_v33  ;;  %1167 = vpow2.f32 %v660_v29  ;;  %v739_v19 = vadd.f32 %v738_v51, %v682_v27  ;;  %v760_v32 = vadd.f32 %v759_v15, %v683_v55  ;;  %v692_v39 = vmul.f32 %v1152_v54, %v2183_v46 }
 0x132   : > { %v1991_v17 = vpop.eup %1161  ;;  %v563_v11 = vmul.f32 0.6931472, %v1160_v10  ;;  %v523_v30 = vpop.xlane.xlu0 %522  ;;  %v720_v29 = vadd.f32 %v719_v3, %v687_v26  ;;  %v695_v2 = vmul.f32 %v1154_v23, %v1848_v16  ;;  %v696_v47 = vmul.f32 %v1980_v25, %v1870_v60  ;;  %v2184_v10 = vld [vmem:[#allocation23_spill] sm:$0xff] }
 0x133   : > { %1169 = vlog2.f32 %v523_v30  ;;  %v740_v62 = vadd.f32 %v739_v19, %v685_v53  ;;  %v761_v56 = vadd.f32 %v760_v32, %v686_v31  ;;  %v697_v53 = vmul.f32 %v1980_v25, %v1872_v18 }
 0x134   : > { %v1164_v36 = vpop.eup %1163  ;;  %v589_v8 = vadd.f32 %v563_v11, %v1625_v5  ;;  %1171 = vpow2.f32 %v1956_v14  ;;  %v693_v5 = vmul.f32 %v1154_v23, %v1839_v63  ;;  %v694_v14 = vmul.f32 %v1154_v23, %v1843_v48 }
 0x135   : > { %v559_v41 = vmul.f32 0.6931472, %v1164_v36  ;;  %v721_v33 = vadd.f32 %v720_v29, %v690_v52  ;;  %v741_v6 = vadd.f32 %v740_v62, %v688_v4  ;;  %v762_v54 = vadd.f32 %v761_v56, %v689_v45 }
 0x136   : > { %v1166_v21 = vpop.eup %1165  ;;  %606 = vst.msk [vmem:[%s1967_s29 + $0x28] sm:$0xff] %vm600_vm0, %v589_v8  ;;  %v698_v23 = vmul.f32 %v1980_v25, %v1875_v35  ;;  %v701_v11 = vmul.f32 %v1983_v61, %v1812_v50  ;;  %v702_v30 = vmul.f32 %v1991_v17, %v1879_v20  ;;  %v703_v4 = vmul.f32 %v1991_v17, %v1881_v37 }
 0x137   : > { %v587_v12 = vadd.f32 %v559_v41, %v1627_v28  ;;  %v555_v7 = vmul.f32 0.6931472, %v1166_v21  ;;  %v507_v27 = vpop.xlane.xlu2 %506  ;;  %v1168_v0 = vpop.eup %1167  ;;  %v722_v28 = vadd.f32 %v721_v33, %v693_v5  ;;  %v742_v48 = vadd.f32 %v741_v6, %v691_v1  ;;  %v2187_v21 = vld [vmem:[#allocation9_spill] sm:$0xff]  ;;  %v2191_v33 = vld [vmem:[#allocation31_spill] sm:$0xff] }
 0x138   : > { %1173 = vlog2.f32 %v507_v27  ;;  %v515_v40 = vpop.xlane.xlu1 %514  ;;  %v763_v16 = vadd.f32 %v762_v54, %v692_v39  ;;  %v705_v3 = vmul.f32 %v1168_v0, %v1888_v49  ;;  %v707_v52 = vmul.f32 %v1168_v0, %v1893_v44  ;;  %v2186_v49 = vld [vmem:[#allocation27_spill] sm:$0xff]  ;;  %v2189_v44 = vld [vmem:[#allocation30_spill] sm:$0xff] }
 0x139   : > { %v1170_v55 = vpop.eup %1169  ;;  %604 = vst.msk [vmem:[%s1967_s29 + $0x18] sm:$0xff] %vm600_vm0, %v587_v12  ;;  %v585_v63 = vadd.f32 %v555_v7, %v1635_v38  ;;  %1175 = vlog2.f32 %v515_v40  ;;  %v699_v38 = vmul.f32 %v1983_v61, %v2184_v10  ;;  %v723_v31 = vadd.f32 %v722_v28, %v696_v47  ;;  %v2190_v7 = vld [vmem:[#allocation29_spill] sm:$0xff]  ;;  %v2192_v40 = vld [vmem:[#allocation14_spill] sm:$0xff]  ;;  %v2194_v10 = vld [vmem:[#allocation8_spill] sm:$0xff] }
 0x13a   : > { %v1172_v57 = vpop.eup %1171  ;;  %v569_v24 = vmul.f32 0.6931472, %v1170_v55  ;;  %1177 = vpow2.f32 %v1959_v13  ;;  %v743_v58 = vadd.f32 %v742_v48, %v694_v14  ;;  %v2185_v13 = vld [vmem:[#allocation24_spill] sm:$0xff]  ;;  %v764_v18 = vadd.f32 %v763_v16, %v695_v2 }
 0x13b   : > { %602 = vst.msk [vmem:[%s1967_s29 + $0x8] sm:$0xff] %vm600_vm0, %v585_v63  ;;  %v535_v60 = vpop.xlane.xlu0 %534  ;;  %v700_v15 = vmul.f32 %v1983_v61, %v2185_v13  ;;  %v724_v26 = vadd.f32 %v723_v31, %v699_v38  ;;  %v706_v61 = vmul.f32 %v1168_v0, %v1890_v22  ;;  %v708_v41 = vmul.f32 %v1172_v57, %v2186_v49  ;;  %v2193_v63 = vld [vmem:[#allocation32_spill] sm:$0xff] }
 0x13c   : > { %v592_v51 = vadd.f32 %v569_v24, %v1669_v9  ;;  %1179 = vlog2.f32 %v535_v60  ;;  %v744_v35 = vadd.f32 %v743_v58, %v697_v53  ;;  %v704_v9 = vmul.f32 %v1991_v17, %v1884_v42 }
 0x13d   : > { %v765_v19 = vadd.f32 %v764_v18, %v698_v23  ;;  %v725_v20 = vadd.f32 %v724_v26, %v702_v30  ;;  %v709_v1 = vmul.f32 %v1172_v57, %v2188_v59  ;;  %v710_v27 = vmul.f32 %v1172_v57, %v2190_v7 }
 0x13e   : > { %v1174_v25 = vpop.eup %1173  ;;  %609 = vst.msk [vmem:[%s1967_s29 + $0x40] sm:$0xff] %vm600_vm0, %v592_v51  ;;  %v745_v8 = vadd.f32 %v744_v35, %v700_v15 }
 0x13f   : > { %v1176_v32 = vpop.eup %1175  ;;  %v561_v36 = vmul.f32 0.6931472, %v1174_v25  ;;  %v519_v50 = vpop.xlane.xlu2 %518  ;;  %v766_v37 = vadd.f32 %v765_v19, %v701_v11  ;;  %v726_v29 = vadd.f32 %v725_v20, %v705_v3  ;;  %v2195_v11 = vld [vmem:[#allocation15_spill] sm:$0xff] }
 0x140   : > { %v1178_v45 = vpop.eup %1177  ;;  %v565_v34 = vmul.f32 0.6931472, %v1176_v32  ;;  %1181 = vlog2.f32 %v519_v50  ;;  %v746_v62 = vadd.f32 %v745_v8, %v703_v4  ;;  %v2196_v32 = vld [vmem:[#allocation20_spill] sm:$0xff] }
 0x141   : > { %v588_v42 = vadd.f32 %v561_v36, %v1607_v43  ;;  %v527_v17 = vpop.xlane.xlu1 %526  ;;  %v767_v46 = vadd.f32 %v766_v37, %v704_v9  ;;  %v711_v5 = vmul.f32 %v1178_v45, %v2189_v44  ;;  %v727_v14 = vadd.f32 %v726_v29, %v708_v41  ;;  %v2197_v37 = vld [vmem:[#allocation17_spill] sm:$0xff] }
 0x142   : > { %v1180_v56 = vpop.eup %1179  ;;  %v590_v22 = vadd.f32 %v565_v34, %v2187_v21  ;;  %1183 = vlog2.f32 %v527_v17  ;;  %v747_v43 = vadd.f32 %v746_v62, %v706_v61  ;;  %v712_v6 = vmul.f32 %v1178_v45, %v2191_v33  ;;  %v2198_v21 = vld [vmem:[#allocation21_spill] sm:$0xff] }
 0x143   : > { %605 = vst.msk [vmem:[%s1967_s29 + $0x20] sm:$0xff] %vm600_vm0, %v588_v42  ;;  %v575_v39 = vmul.f32 0.6931472, %v1180_v56  ;;  %v768_v0 = vadd.f32 %v767_v46, %v707_v52  ;;  %v728_v47 = vadd.f32 %v727_v14, %v711_v5  ;;  %v713_v28 = vmul.f32 %v1178_v45, %v2193_v63  ;;  %v2199_v44 = vld [vmem:[#allocation25_spill] sm:$0xff] }
 0x144   : > { %607 = vst.msk [vmem:[%s1967_s29 + $0x30] sm:$0xff] %vm600_vm0, %v590_v22  ;;  %v547_v12 = vpop.xlane.xlu0 %546  ;;  %v748_v54 = vadd.f32 %v747_v43, %v709_v1 }
 0x145   : > { %v595_v2 = vadd.f32 %v575_v39, %v2192_v40  ;;  %1185 = vlog2.f32 %v547_v12  ;;  %v769_v48 = vadd.f32 %v768_v0, %v710_v27  ;;  %v729_v16 = vrot.slane %v728_v47, 4  ;;  %v2200_v27 = vld [vmem:[#allocation26_spill] sm:$0xff] }
 0x146   : > { %v1182_v55 = vpop.eup %1181  ;;  %v749_v60 = vadd.f32 %v748_v54, %v712_v6 }
 0x147   : > { %v567_v24 = vmul.f32 0.6931472, %v1182_v55  ;;  %612 = vst.msk [vmem:[%s1967_s29 + $0x58] sm:$0xff] %vm600_vm0, %v595_v2  ;;  %v531_v53 = vpop.xlane.xlu2 %530  ;;  %v770_v23 = vadd.f32 %v769_v48, %v713_v28  ;;  %v730_v58 = vadd.f32 %v729_v16, %v728_v47  ;;  %v796_v2 = vlaneseq  ;;  %v2201_v47 = vld [vmem:[#allocation33_spill] sm:$0xff] }
 0x148   : > { %v1184_v57 = vpop.eup %1183  ;;  %1187 = vlog2.f32 %v531_v53  ;;  %v750_v51 = vrot.slane %v749_v60, 4 }
 0x149   : > { %v591_v38 = vadd.f32 %v567_v24, %v2194_v10  ;;  %v571_v31 = vmul.f32 0.6931472, %v1184_v57  ;;  %v771_v15 = vrot.slane %v770_v23, 4  ;;  %v731_v26 = vrot.slane %v730_v58, 2 }
 0x14a   : > { %v539_v13 = vpop.xlane.xlu1 %538  ;;  %v751_v35 = vadd.f32 %v750_v51, %v749_v60  ;;  %vm798_vm3 = vcmp.lt.s32.totalorder %v796_v2, 384 }
 0x14b   : > { %v1186_v18 = vpop.eup %1185  ;;  %608 = vst.msk [vmem:[%s1967_s29 + $0x38] sm:$0xff] %vm600_vm0, %v591_v38  ;;  %v593_v30 = vadd.f32 %v571_v31, %v2195_v11  ;;  %1189 = vlog2.f32 %v539_v13  ;;  %v772_v4 = vadd.f32 %v771_v15, %v770_v23  ;;  %v732_v9 = vadd.f32 %v731_v26, %v730_v58 }
 0x14c   : > { %v581_v25 = vmul.f32 0.6931472, %v1186_v18  ;;  %v752_v3 = vrot.slane %v751_v35, 2 }
 0x14d   : > { %610 = vst.msk [vmem:[%s1967_s29 + $0x48] sm:$0xff] %vm600_vm0, %v593_v30  ;;  %v773_v50 = vrot.slane %v772_v4, 2  ;;  %v733_v8 = vrot.slane %v732_v9, 1 }
 0x14e   : > { %v1188_v19 = vpop.eup %1187  ;;  %v598_v36 = vadd.f32 %v581_v25, %v2196_v32  ;;  %v753_v45 = vadd.f32 %v752_v3, %v751_v35 }
 0x14f   : > { %v573_v61 = vmul.f32 0.6931472, %v1188_v19  ;;  %v543_v20 = vpop.xlane.xlu2 %542  ;;  %v774_v34 = vadd.f32 %v773_v50, %v772_v4  ;;  %v734_v17 = vadd.f32 %v733_v8, %v732_v9 }
 0x150   : > { %615 = vst.msk [vmem:[%s1967_s29 + $0x70] sm:$0xff] %vm600_vm0, %v598_v36  ;;  %1191 = vlog2.f32 %v543_v20  ;;  %v754_v49 = vrot.slane %v753_v45, 1 }
 0x151   : > { %v1190_v52 = vpop.eup %1189  ;;  %v594_v42 = vadd.f32 %v573_v61, %v2197_v37  ;;  %v775_v62 = vrot.slane %v774_v34, 1 }
 0x152   : > { %v577_v41 = vmul.f32 0.6931472, %v1190_v52  ;;  %v551_v29 = vpop.xlane.xlu1 %550  ;;  %v755_v56 = vadd.f32 %v754_v49, %v753_v45 }
 0x153   : > { %611 = vst.msk [vmem:[%s1967_s29 + $0x50] sm:$0xff] %vm600_vm0, %v594_v42  ;;  %1193 = vlog2.f32 %v551_v29  ;;  %v776_v59 = vadd.f32 %v775_v62, %v774_v34 }
 0x154   : > { %v596_v22 = vadd.f32 %v577_v41, %v2198_v21  ;;  %1195 = vlog2.f32 %v734_v17 }
 0x155   : > { %1197 = vlog2.f32 %v755_v56 }
 0x156   : > { %v1192_v1 = vpop.eup %1191  ;;  %613 = vst.msk [vmem:[%s1967_s29 + $0x60] sm:$0xff] %vm600_vm0, %v596_v22  ;;  %1199 = vlog2.f32 %v776_v59 }
 0x157   : > { %v579_v46 = vmul.f32 0.6931472, %v1192_v1 }
 0x159   : > { %v1194_v39 = vpop.eup %1193  ;;  %v597_v5 = vadd.f32 %v579_v46, %v2199_v44 }
 0x15a   : > { %v1196_v14 = vpop.eup %1195  ;;  %v583_v43 = vmul.f32 0.6931472, %v1194_v39 }
 0x15b   : > { %v1198_v12 = vpop.eup %1197  ;;  %614 = vst.msk [vmem:[%s1967_s29 + $0x68] sm:$0xff] %vm600_vm0, %v597_v5  ;;  %v778_v6 = vmul.f32 0.6931472, %v1196_v14 }
 0x15c   : > { %v1200_v7 = vpop.eup %1199  ;;  %v599_v33 = vadd.f32 %v583_v43, %v2200_v27  ;;  %v780_v0 = vmul.f32 0.6931472, %v1198_v12 }
 0x15d   : > { %v782_v40 = vmul.f32 0.6931472, %v1200_v7  ;;  %v783_v63 = vadd.f32 %v778_v6, %v2201_v47 }
 0x15e   : > { %616 = vst.msk [vmem:[%s1967_s29 + $0x78] sm:$0xff] %vm600_vm0, %v599_v33  ;;  %v784_v54 = vadd.f32 %v780_v0, %v2201_v47 }
 0x15f   : > { %v785_v55 = vadd.f32 %v782_v40, %v2201_v47 }
 0x160   : > { %v789_v28 = vrot.slane %v784_v54, 7 }
 0x161   : > { %v790_v48 = vrot.slane %v785_v55, 6 }
 0x162   : > { %v792_v24 = vsel %vm791_vm1, %v783_v63, %v789_v28 }
 0x163   : > { %v794_v53 = vsel %vm793_vm2, %v792_v24, %v790_v48 }
 0x164   : > { %800 = vst.msk [vmem:[%s196_s12] sm:$0x7] %vm798_vm3, %v794_v53 }
 0x165   : > { %1258 = shalt.err (!%p1255_p12)
}
 0x166   : > { %973 = dma.vmem_to_hbm [thread:$0]  (%p1383_p9), %s830_s7, 48, %s832_s8, %s811_s16  }
 0x167 PF: > { %p984_p13 = scmp.ge.s32.totalorder %s1313_s14, 2  ;;  %s855_s15 = sand.u32 1, %s1293_s9  }
 0x168   : > { %s856_s28 = scalar_lea.sflag [#allocation4], %s855_s15 }
 0x169   : > { %p980_p0 = pnand %p984_p13, %p1390_p11 }
 0x16b   : > { %p981_p1 = pneg %p980_p0 }
 0x16d   : > { %1288 = dma.done.wait (%p981_p1), %s856_s28, 48  }
 0x16e   : > { %1290 = vsyncadd (%p981_p1), %s856_s28, 4294967248  ;;  %s19_s14 = sadd.s32 1, %s1313_s14   ;;  %s2202_s9 = smov %s1297_s10 }
 0x16f   : > { %p16_p2 = scmp.ge.s32.totalorder %s19_s14, 5   ;;  %s2203_s10 = smov %s1301_s11 }
 0x170   : > { %s2204_s11 = smov %s1388_s23  ;;  %s2205_s12 = smov %s1309_s13 }
 0x171   : > { %s2206_s13 = smov %s2208_s17  ;;  %18 = sbr.rel (!%p16_p2) target bundleno = 6 (0x6), region = 81 }
 0x176   :  { %862 = vsyncpa [#allocation3], 1 }
 0x177   :  { %864 = vsyncpa [#allocation3 + $0x1], 1 }
 0x178   :  { %865 = vsyncpa [#allocation4], 1 }
 0x179   :  { %867 = vsyncpa [#allocation4 + $0x1], 1 }

</bundles_post_ra>
